<compile_context>
chip_gen: v7x
topology: tpu7x:2x2x1
jax: 0.10.0
libtpu: 0.0.40
codegen_flags: <defaults>
</compile_context>

<pallas_src>
import functools

import jax
import jax.numpy as jnp
from jax.experimental import pallas as pl
from jax.experimental.pallas import tpu as pltpu


_LANES = 128           # vreg lane width
_MAX_TILE_ROWS = 2048  # 2048 x 128 f32 = 1 MiB per input buffer
_MIN_SPLIT_ROWS = 512  # split rows across 2 TensorCores above ~64K elements


def _bce_sum_kernel(p_ref, t_ref, out_ref, acc_ref, *,
                    tiles_per_chunk, tile_rows, total_rows, binary_targets):
    """Accumulates the sum of per-element BCE over the reduction grid axis."""
    c = pl.program_id(0)   # chunk axis ("parallel", one per TensorCore on v7x)
    i = pl.program_id(1)   # tile-within-chunk axis (reduction, "arbitrary")

    @pl.when(i == 0)
    def _init():
        acc_ref[...] = jnp.zeros_like(acc_ref)

    row0 = (c * tiles_per_chunk + i) * tile_rows        # logical first row of this tile
    p = p_ref[...].astype(jnp.float32)                  # in-kernel cast (cheap VPU)
    t = t_ref[...].astype(jnp.float32)

    def accumulate(p, t):
        if binary_targets:
            # Hard {0,1} targets: one EUP log per vreg instead of two.
            sel = jnp.where(t != 0.0, p, 1.0 - p)
            acc_ref[...] -= jnp.maximum(jnp.log(sel), -100.0)
        else:
            # Exact F.binary_cross_entropy (soft targets OK).
            # Clamp BEFORE the multiply so 0 * (-inf) can never appear.
            log_p = jnp.maximum(jnp.log(p), -100.0)
            log_q = jnp.maximum(jnp.log(1.0 - p), -100.0)
            acc_ref[...] -= t * log_p + (1.0 - t) * log_q

    is_full = row0 + tile_rows <= total_rows

    @pl.when(is_full)
    def _full_tile():                                   # hot path: no masking work
        accumulate(p, t)

    @pl.when(jnp.logical_not(is_full))
    def _ragged_tile():                                 # last/OOB tile: mask invalid rows
        rid = jax.lax.broadcasted_iota(jnp.int32, (tile_rows, _LANES), 0) + row0
        valid = rid < total_rows
        # (p=1, t=1) contributes exactly 0 with the clamped logs.
        accumulate(jnp.where(valid, p, 1.0), jnp.where(valid, t, 1.0))

    @pl.when(i == pl.num_programs(1) - 1)
    def _finalize():
        # Single cross-sublane reduce per chunk; keep the store lane-dense
        # (last dim 128) so it is an unmasked vst.
        lane_sums = jnp.sum(acc_ref[...], axis=0, keepdims=True)   # (1, 128)
        out_ref[...] = lane_sums[None]                              # (1, 1, 128)


def binary_focal_loss(inputs, targets, *, alpha=1.0, gamma=2.0,
                      binary_targets=False):
    """JAX/Pallas equivalent of BinaryFocalLoss.forward (returns a scalar).

    `binary_targets=True` enables a single-log fast path that is exact only for
    hard {0, 1} targets; the default keeps the general two-log formula so soft
    targets match F.binary_cross_entropy bit-for-bit in intent.
    """
    p = inputs.reshape(-1)
    t = targets.reshape(-1)
    n = p.shape[0]

    # Dtype passthrough: DMA native dtypes, cast to f32 inside the kernel.
    # Only normalize dtypes the kernel should not see (bool / >32-bit); never
    # force a wrapper-side f32 copy of already-narrow streams.
    if (not jnp.issubdtype(p.dtype, jnp.floating)) or p.dtype.itemsize > 4:
        p = p.astype(jnp.float32)
    if t.dtype == jnp.bool_:
        t = t.astype(jnp.int8)          # 1-byte stream; avoids i1 lowering paths
    elif t.dtype.itemsize > 4:
        t = t.astype(jnp.float32)

    n_tail = n % _LANES
    n_main = n - n_tail
    rows = n_main // _LANES

    total = jnp.zeros((), jnp.float32)

    if rows > 0:
        # Lane-dense view of the 128-aligned prefix (no padding copy; a pure
        # reshape/bitcast when N is a multiple of 128).
        p2d = p[:n_main].reshape(rows, _LANES)
        t2d = t[:n_main].reshape(rows, _LANES)

        # Decide the core split from `rows` first, then tile within each chunk.
        if rows >= _MIN_SPLIT_ROWS:
            num_chunks = 2
            rows_per_chunk = -(-rows // num_chunks)
            # Multiple of 32 keeps the block legal for f32/bf16/int8 inputs.
            tile_rows = min(_MAX_TILE_ROWS, ((rows_per_chunk + 31) // 32) * 32)
        else:
            num_chunks = 1
            tile_rows = rows            # single full-extent tile (any dtype OK)
        total_tiles = -(-rows // tile_rows)
        tiles_per_chunk = -(-total_tiles // num_chunks)

        def in_map(c, i):
            # Clamp so a fully out-of-range step in the last chunk re-reads a
            # valid tile; its contribution is masked to zero inside the kernel.
            return (jnp.minimum(c * tiles_per_chunk + i, total_tiles - 1), 0)

        kernel = functools.partial(
            _bce_sum_kernel,
            tiles_per_chunk=tiles_per_chunk, tile_rows=tile_rows,
            total_rows=rows, binary_targets=bool(binary_targets))

        partials = pl.pallas_call(
            kernel,
            out_shape=jax.ShapeDtypeStruct((num_chunks, 1, _LANES), jnp.float32),
            grid_spec=pltpu.PrefetchScalarGridSpec(
                num_scalar_prefetch=0,
                grid=(num_chunks, tiles_per_chunk),
                in_specs=[
                    pl.BlockSpec((tile_rows, _LANES), in_map),   # probabilities
                    pl.BlockSpec((tile_rows, _LANES), in_map),   # targets
                ],
                out_specs=pl.BlockSpec((1, 1, _LANES), lambda c, i: (c, 0, 0)),
                # TODO(synk): per-vreg register accumulation (8x128 scratch)
                # skipped -- few-% win vs. lowering risk; kernel stays HBM-bound.
                scratch_shapes=[pltpu.VMEM((tile_rows, _LANES), jnp.float32)],
            ),
            compiler_params=pltpu.CompilerParams(
                dimension_semantics=("parallel", "arbitrary"),
                vmem_limit_bytes=32 * 1024 * 1024,
            ),
        )(p2d, t2d)
        total = jnp.sum(partials)

    if n_tail > 0:
        # <128 leftover elements: cheaper as one tiny fused XLA op than an
        # extra (mostly padded) kernel tile.
        p_tail = p[n_main:].astype(jnp.float32)
        t_tail = t[n_main:].astype(jnp.float32)
        log_p = jnp.maximum(jnp.log(p_tail), -100.0)
        log_q = jnp.maximum(jnp.log(1.0 - p_tail), -100.0)
        total = total + jnp.sum(-(t_tail * log_p + (1.0 - t_tail) * log_q))

    bce = total / jnp.float32(n)

    # Scalar focal modulation; integer gamma specialized to repeated multiply.
    one_minus = 1.0 - jnp.exp(-bce)
    g = float(gamma)
    if g.is_integer() and 0 <= g <= 8:
        mod = jnp.float32(1.0)
        for _ in range(int(g)):
            mod = mod * one_minus
    else:
        mod = one_minus ** jnp.float32(g)

    return jnp.float32(alpha) * mod * bce


def _binary_focal_loss_ref(inputs, targets, *, alpha=1.0, gamma=2.0):
    """Pure-JAX reference mirroring the PyTorch forward."""
    p = inputs.reshape(-1).astype(jnp.float32)
    t = targets.reshape(-1).astype(jnp.float32)
    log_p = jnp.maximum(jnp.log(p), -100.0)
    log_q = jnp.maximum(jnp.log(1.0 - p), -100.0)
    bce = jnp.mean(-(t * log_p + (1.0 - t) * log_q))
    return alpha * (1.0 - jnp.exp(-bce)) ** gamma * bce


if __name__ == "__main__":
    key = jax.random.PRNGKey(0)
    k1, k2, k3, k4 = jax.random.split(key, 4)

    # Small case matching the module's expected call: (N, 1) probabilities and
    # (N, 1) float targets, batch not a multiple of 128 (exercises the tail).
    N = 1000
    probs = jax.nn.sigmoid(jax.random.normal(k1, (N, 1), dtype=jnp.float32))
    targs = jax.random.bernoulli(k2, 0.5, (N, 1)).astype(jnp.float32)

    fl = jax.jit(lambda a, b: binary_focal_loss(a, b, alpha=1.0, gamma=2.0))
    out = jax.block_until_ready(fl(probs, targs))
    ref = _binary_focal_loss_ref(probs, targs, alpha=1.0, gamma=2.0)
    assert jnp.allclose(out, ref, atol=1e-6, rtol=1e-5), (out, ref)

    # Same data through the hard-binary-target fast path and non-integer gamma.
    fl_bin = jax.jit(lambda a, b: binary_focal_loss(
        a, b, alpha=0.5, gamma=1.7, binary_targets=True))
    out_b = jax.block_until_ready(fl_bin(probs, targs))
    ref_b = _binary_focal_loss_ref(probs, targs, alpha=0.5, gamma=1.7)
    assert jnp.allclose(out_b, ref_b, atol=1e-6, rtol=1e-5), (out_b, ref_b)

    # Larger case: multi-tile reduction per chunk, 2-way parallel chunk axis,
    # ragged + fully out-of-range masked tiles, int8 target stream, f32 probs.
    N2 = 1_234_567
    probs2 = jax.nn.sigmoid(jax.random.normal(k3, (N2,), dtype=jnp.float32))
    targs2 = jax.random.bernoulli(k4, 0.3, (N2,)).astype(jnp.int8)
    fl2 = jax.jit(lambda a, b: binary_focal_loss(a, b, alpha=0.25, gamma=2.0))
    out2 = jax.block_until_ready(fl2(probs2, targs2))
    ref2 = _binary_focal_loss_ref(probs2, targs2, alpha=0.25, gamma=2.0)
    assert jnp.allclose(out2, ref2, atol=1e-5, rtol=1e-4), (out2, ref2)

    print("KERNEL_OK")
</pallas_src>

<mosaic_0001>
module attributes {stable_mosaic.version = 11 : i64} {
  func.func @_bce_sum_kernel(%arg0: i32, %arg1: i32, %arg2: memref<7x128xf32, #tpu.memory_space<vmem>>, %arg3: memref<7x128xf32, #tpu.memory_space<vmem>>, %arg4: memref<1x1x128xf32, #tpu.memory_space<vmem>>, %arg5: memref<7x128xf32, #tpu.memory_space<vmem>>) attributes {dimension_semantics = [#tpu.dimension_semantics<parallel>, #tpu.dimension_semantics<arbitrary>], iteration_bounds = array<i64: 1, 1>, scalar_prefetch = 0 : i64, scratch_operands = 1 : i64, tpu.core_type = #tpu.core_type<tc>, window_params = [{transform_indices = @transform_0, window_bounds = array<i64: 7, 128>}, {transform_indices = @transform_1, window_bounds = array<i64: 7, 128>}, {transform_indices = @transform_2, window_bounds = array<i64: 1, 1, 128>}]} {
    %c0_i32 = arith.constant 0 : i32
    %0 = arith.cmpi eq, %arg1, %c0_i32 : i32
    %1 = arith.extui %0 : i1 to i32
    %c0_i32_0 = arith.constant 0 : i32
    %2 = arith.cmpi ne, %1, %c0_i32_0 : i32
    scf.if %2 {
      %cst = arith.constant 0.000000e+00 : f32
      %18 = vector.broadcast %cst : f32 to vector<7x128xf32>
      %c0_10 = arith.constant 0 : index
      %c0_11 = arith.constant 0 : index
      %19 = vector.load %arg5[%c0_10, %c0_11] : memref<7x128xf32, #tpu.memory_space<vmem>>, vector<7x128xf32>
      tpu.vector_store %arg5[%c0_10, %c0_11], %18 {strides = array<i32>} : memref<7x128xf32, #tpu.memory_space<vmem>>, vector<7x128xf32>,
    } else {
    }
    %c1_i32 = arith.constant 1 : i32
    %3 = arith.muli %arg0, %c1_i32 : i32
    %4 = arith.addi %3, %arg1 : i32
    %c7_i32 = arith.constant 7 : i32
    %5 = arith.muli %4, %c7_i32 : i32
    %c0 = arith.constant 0 : index
    %c0_1 = arith.constant 0 : index
    %6 = vector.load %arg2[%c0, %c0_1] : memref<7x128xf32, #tpu.memory_space<vmem>>, vector<7x128xf32>
    %c0_2 = arith.constant 0 : index
    %c0_3 = arith.constant 0 : index
    %7 = vector.load %arg3[%c0_2, %c0_3] : memref<7x128xf32, #tpu.memory_space<vmem>>, vector<7x128xf32>
    %c7_i32_4 = arith.constant 7 : i32
    %8 = arith.addi %5, %c7_i32_4 : i32
    %c7_i32_5 = arith.constant 7 : i32
    %9 = arith.cmpi sle, %8, %c7_i32_5 : i32
    %10 = arith.extui %9 : i1 to i32
    %c0_i32_6 = arith.constant 0 : i32
    %11 = arith.cmpi ne, %10, %c0_i32_6 : i32
    scf.if %11 {
      %18 = math.log %6 : vector<7x128xf32>
      %cst = arith.constant -1.000000e+02 : f32
      %19 = vector.broadcast %cst : f32 to vector<7x128xf32>
      %20 = arith.maximumf %18, %19 : vector<7x128xf32>
      %cst_10 = arith.constant 1.000000e+00 : f32
      %21 = vector.broadcast %cst_10 : f32 to vector<7x128xf32>
      %22 = arith.subf %21, %6 : vector<7x128xf32>
      %23 = math.log %22 : vector<7x128xf32>
      %cst_11 = arith.constant -1.000000e+02 : f32
      %24 = vector.broadcast %cst_11 : f32 to vector<7x128xf32>
      %25 = arith.maximumf %23, %24 : vector<7x128xf32>
      %c0_12 = arith.constant 0 : index
      %c0_13 = arith.constant 0 : index
      %26 = vector.load %arg5[%c0_12, %c0_13] : memref<7x128xf32, #tpu.memory_space<vmem>>, vector<7x128xf32>
      %27 = arith.mulf %7, %20 : vector<7x128xf32>
      %cst_14 = arith.constant 1.000000e+00 : f32
      %28 = vector.broadcast %cst_14 : f32 to vector<7x128xf32>
      %29 = arith.subf %28, %7 : vector<7x128xf32>
      %30 = arith.mulf %29, %25 : vector<7x128xf32>
      %31 = arith.addf %27, %30 : vector<7x128xf32>
      %32 = arith.subf %26, %31 : vector<7x128xf32>
      %c0_15 = arith.constant 0 : index
      %c0_16 = arith.constant 0 : index
      %33 = vector.load %arg5[%c0_15, %c0_16] : memref<7x128xf32, #tpu.memory_space<vmem>>, vector<7x128xf32>
      tpu.vector_store %arg5[%c0_15, %c0_16], %32 {strides = array<i32>} : memref<7x128xf32, #tpu.memory_space<vmem>>, vector<7x128xf32>,
    } else {
    }
    %true = arith.constant true
    %12 = arith.xori %9, %true : i1
    %13 = arith.extui %12 : i1 to i32
    %c0_i32_7 = arith.constant 0 : i32
    %14 = arith.cmpi ne, %13, %c0_i32_7 : i32
    scf.if %14 {
      %18 = tpu.iota {dimensions = array<i32: 0>} : vector<7x128xi32>
      %19 = vector.broadcast %5 : i32 to vector<7x128xi32>
      %20 = arith.addi %18, %19 : vector<7x128xi32>
      %c7_i32_10 = arith.constant 7 : i32
      %21 = vector.broadcast %c7_i32_10 : i32 to vector<7x128xi32>
      %22 = arith.cmpi slt, %20, %21 : vector<7x128xi32>
      %cst = arith.constant 1.000000e+00 : f32
      %23 = vector.broadcast %cst : f32 to vector<7x128xf32>
      %24 = arith.select %22, %6, %23 : vector<7x128xi1>, vector<7x128xf32>
      %cst_11 = arith.constant 1.000000e+00 : f32
      %25 = vector.broadcast %cst_11 : f32 to vector<7x128xf32>
      %26 = arith.select %22, %7, %25 : vector<7x128xi1>, vector<7x128xf32>
      %27 = math.log %24 : vector<7x128xf32>
      %cst_12 = arith.constant -1.000000e+02 : f32
      %28 = vector.broadcast %cst_12 : f32 to vector<7x128xf32>
      %29 = arith.maximumf %27, %28 : vector<7x128xf32>
      %cst_13 = arith.constant 1.000000e+00 : f32
      %30 = vector.broadcast %cst_13 : f32 to vector<7x128xf32>
      %31 = arith.subf %30, %24 : vector<7x128xf32>
      %32 = math.log %31 : vector<7x128xf32>
      %cst_14 = arith.constant -1.000000e+02 : f32
      %33 = vector.broadcast %cst_14 : f32 to vector<7x128xf32>
      %34 = arith.maximumf %32, %33 : vector<7x128xf32>
      %c0_15 = arith.constant 0 : index
      %c0_16 = arith.constant 0 : index
      %35 = vector.load %arg5[%c0_15, %c0_16] : memref<7x128xf32, #tpu.memory_space<vmem>>, vector<7x128xf32>
      %36 = arith.mulf %26, %29 : vector<7x128xf32>
      %cst_17 = arith.constant 1.000000e+00 : f32
      %37 = vector.broadcast %cst_17 : f32 to vector<7x128xf32>
      %38 = arith.subf %37, %26 : vector<7x128xf32>
      %39 = arith.mulf %38, %34 : vector<7x128xf32>
      %40 = arith.addf %36, %39 : vector<7x128xf32>
      %41 = arith.subf %35, %40 : vector<7x128xf32>
      %c0_18 = arith.constant 0 : index
      %c0_19 = arith.constant 0 : index
      %42 = vector.load %arg5[%c0_18, %c0_19] : memref<7x128xf32, #tpu.memory_space<vmem>>, vector<7x128xf32>
      tpu.vector_store %arg5[%c0_18, %c0_19], %41 {strides = array<i32>} : memref<7x128xf32, #tpu.memory_space<vmem>>, vector<7x128xf32>,
    } else {
    }
    %c0_i32_8 = arith.constant 0 : i32
    %15 = arith.cmpi eq, %arg1, %c0_i32_8 : i32
    %16 = arith.extui %15 : i1 to i32
    %c0_i32_9 = arith.constant 0 : i32
    %17 = arith.cmpi ne, %16, %c0_i32_9 : i32
    scf.if %17 {
      %c0_10 = arith.constant 0 : index
      %c0_11 = arith.constant 0 : index
      %18 = vector.load %arg5[%c0_10, %c0_11] : memref<7x128xf32, #tpu.memory_space<vmem>>, vector<7x128xf32>
      %cst = arith.constant dense<0.000000e+00> : vector<128xf32>
      %19 = vector.multi_reduction <add>, %18, %cst [0] : vector<7x128xf32> to vector<128xf32>
      %20 = vector.shape_cast %19 : vector<128xf32> to vector<1x128xf32>
      %21 = vector.shape_cast %20 : vector<1x128xf32> to vector<1x1x128xf32>
      %c0_12 = arith.constant 0 : index
      %c0_13 = arith.constant 0 : index
      %c0_14 = arith.constant 0 : index
      %22 = vector.load %arg4[%c0_12, %c0_13, %c0_14] : memref<1x1x128xf32, #tpu.memory_space<vmem>>, vector<1x1x128xf32>
      tpu.vector_store %arg4[%c0_12, %c0_13, %c0_14], %21 {strides = array<i32>} : memref<1x1x128xf32, #tpu.memory_space<vmem>>, vector<1x1x128xf32>,
    } else {
    }
    return
  }
  func.func @transform_0(%arg0: i32, %arg1: i32) -> (i32, i32) {
    %c1_i32 = arith.constant 1 : i32
    %0 = arith.muli %arg0, %c1_i32 : i32
    %1 = arith.addi %0, %arg1 : i32
    %c0_i32 = arith.constant 0 : i32
    %2 = arith.minsi %1, %c0_i32 : i32
    %c0_i32_0 = arith.constant 0 : i32
    %c0_i32_1 = arith.constant 0 : i32
    return %2, %c0_i32_0 : i32, i32
  }
  func.func @transform_1(%arg0: i32, %arg1: i32) -> (i32, i32) {
    %c1_i32 = arith.constant 1 : i32
    %0 = arith.muli %arg0, %c1_i32 : i32
    %1 = arith.addi %0, %arg1 : i32
    %c0_i32 = arith.constant 0 : i32
    %2 = arith.minsi %1, %c0_i32 : i32
    %c0_i32_0 = arith.constant 0 : i32
    %c0_i32_1 = arith.constant 0 : i32
    return %2, %c0_i32_0 : i32, i32
  }
  func.func @transform_2(%arg0: i32, %arg1: i32) -> (i32, i32, i32) {
    %c0_i32 = arith.constant 0 : i32
    %c0_i32_0 = arith.constant 0 : i32
    %c0_i32_1 = arith.constant 0 : i32
    return %arg0, %c0_i32, %c0_i32_0 : i32, i32, i32
  }
}

</mosaic_0001>

<bundles_post_ra>
// kernel: _lambda_.1
= control target key start
LH: loop header
LB: loop body
LE: loop exit
PB: predicated region body
PF: predicated region fallthrough
CT: control target
= control target key end

     0   :  { %v152_v0 = vmov 0.0   ;;  %vm122_vm0 = vcmask 1046528   ;;  %s177_s0 = inlined_call_operand.vmem [shape: f32[7,128], index: 0, kind: input, shape index: {}]   ;;  %s178_s1 = inlined_call_operand.vmem [shape: f32[7,128], index: 1, kind: input, shape index: {}]   ;;  %s179_s2 = inlined_call_operand.vmem [shape: f32[1,1,128], index: 2, kind: output, shape index: {}]  }
   0x1   :  { %69 = vst [vmem:[#allocation2] sm:$0x7f] %v152_v0  ;;  %v72_v1 = vld [vmem:[%s177_s0] sm:$0x7f] }
   0x2   :  { %148 = vlog2.f32 %v72_v1  ;;  %v82_v2 = vsub.f32 1.0, %v72_v1  ;;  %v73_v4 = vld [vmem:[%s178_s1] sm:$0x7f] }
   0x3   :  { %v88_v9 = vsub.f32 1.0, %v73_v4 }
   0x4   :  { %150 = vlog2.f32 %v82_v2 }
   0x8   :  { %v86_v13 = vld [vmem:[#allocation2] sm:$0x7f] }
   0xc   :  { %v149_v3 = vpop.eup %148 }
   0xd   :  { %v80_v5 = vmul.f32 0.6931472, %v149_v3 }
   0xe   :  { %v151_v6 = vpop.eup %150 }
   0xf   :  { %v81_v7 = vmax.f32 %v80_v5, -100.0  ;;  %v84_v8 = vmul.f32 0.6931472, %v151_v6 }
  0x11   :  { %v85_v10 = vmax.f32 %v84_v8, -100.0  ;;  %v87_v11 = vmul.f32 %v81_v7, %v73_v4 }
  0x13   :  { %v89_v12 = vmul.f32 %v88_v9, %v85_v10 }
  0x15   :  { %v90_v14 = vadd.f32 %v89_v12, %v87_v11 }
  0x17   :  { %v91_v15 = vsub.f32 %v86_v13, %v90_v14 }
  0x19   :  { %92 = vst [vmem:[#allocation2] sm:$0x7f] %v91_v15 }
  0x20   :  { %v121_v16 = vld [vmem:[#allocation2] sm:$0x7f] }
  0x21   :  { %v123_v17 = vsel %vm122_vm0, %v121_v16, 0.0 }
  0x22   :  { %v124_v18 = vrot.slane %v123_v17, 4 }
  0x24   :  { %v125_v19 = vadd.f32 %v124_v18, %v123_v17 }
  0x26   :  { %v126_v20 = vrot.slane %v125_v19, 2 }
  0x28   :  { %v127_v21 = vadd.f32 %v126_v20, %v125_v19 }
  0x2a   :  { %v128_v22 = vrot.slane %v127_v21, 1 }
  0x2c   :  { %v129_v23 = vadd.f32 %v128_v22, %v127_v21 }
  0x2e   :  { %130 = vst [vmem:[%s179_s2] sm:$0x1] %v129_v23 }

</bundles_post_ra>
